<compile_context>
chip_gen: v6e
topology: v6e:2x2x1
jax: 0.10.0
libtpu: 0.0.40
codegen_flags: <defaults>
</compile_context>

<pallas_src>
import jax
import jax.numpy as jnp
from jax.experimental import pallas as pl
from jax.experimental.pallas import tpu as pltpu

IN_FEATURES = 5
OUT_FEATURES = 5

# Largest batch handled as a single gridless block (no pipeline machinery).
# Transposed layout: an (8-padded, B) f32 tile is 32*B bytes, so 32768 rows is
# ~1 MiB each for x and out -> trivially fits every chip generation.
_SINGLE_BLOCK_MAX_BATCH = 32768

# Batch (lane) tile for the pipelined path.  Multiple of 128 (lane dim).
# Double-buffered x + out tiles total ~4 MiB, well under v5e's 16 MiB scoped
# VMEM default and v7x's 64 MiB physical VMEM.
_BATCH_TILE = 32768


def linear_kernel(xT_ref, w_ref, b_ref, oT_ref):
    # xT_ref: (IN, Bt)   -- batch on the lane axis (dense)
    # w_ref:  (OUT, IN)  -- PyTorch layout, used directly
    # b_ref:  (OUT, 1)
    # oT_ref: (OUT, Bt)
    xT = xT_ref[...]
    w = w_ref[...]
    # yT[j, :] = b[j] + sum_k W[j, k] * xT[k, :]
    # 5 broadcast-FMAs on lane-dense vregs (pure VPU; the MXU would be >96%
    # zero-padded for a 5x5 contraction).
    acc = b_ref[...] + w[:, 0:1] * xT[0:1, :]
    for k in range(1, IN_FEATURES):
        acc = acc + w[:, k : k + 1] * xT[k : k + 1, :]
    oT_ref[...] = acc.astype(oT_ref.dtype)


def linear_forward(
    x,
    weight,
    bias,
    *,
    batch_tile=_BATCH_TILE,
    single_block_max_batch=_SINGLE_BLOCK_MAX_BATCH,
):
    """y = x @ weight.T + bias  (PyTorch nn.Linear semantics).

    x:      (B, IN_FEATURES)            float32
    weight: (OUT_FEATURES, IN_FEATURES) float32  (PyTorch layout)
    bias:   (OUT_FEATURES,)             float32
    returns (B, OUT_FEATURES)           float32
    """
    B = x.shape[0]
    # Layout plumbing only (not compute hoisting): present x lane-dense.
    xT = x.T                                   # (IN, B)
    b_col = bias.reshape(OUT_FEATURES, 1)      # (OUT, 1)
    out_shape = jax.ShapeDtypeStruct((OUT_FEATURES, B), x.dtype)

    if B <= single_block_max_batch:
        # Single-tile problem: no grid, no pipeline prologue/epilogue.
        yT = pl.pallas_call(
            linear_kernel,
            out_shape=out_shape,
            in_specs=[
                pl.BlockSpec(memory_space=pltpu.MemorySpace.VMEM),
                pl.BlockSpec(memory_space=pltpu.MemorySpace.VMEM),
                pl.BlockSpec(memory_space=pltpu.MemorySpace.VMEM),
            ],
            out_specs=pl.BlockSpec(memory_space=pltpu.MemorySpace.VMEM),
        )(xT, weight, b_col)
    else:
        # Large batch: tile the (lane) batch axis.  Overhead-bound problem, so
        # few, big tiles; "parallel" lets v7x split the axis across its two
        # TensorCores (no-op on single-TC v5e/v6e).
        grid = (pl.cdiv(B, batch_tile),)
        yT = pl.pallas_call(
            linear_kernel,
            out_shape=out_shape,
            grid=grid,
            in_specs=[
                pl.BlockSpec((IN_FEATURES, batch_tile), lambda i: (0, i)),
                pl.BlockSpec((OUT_FEATURES, IN_FEATURES), lambda i: (0, 0)),
                pl.BlockSpec((OUT_FEATURES, 1), lambda i: (0, 0)),
            ],
            out_specs=pl.BlockSpec((OUT_FEATURES, batch_tile), lambda i: (0, i)),
            compiler_params=pltpu.CompilerParams(
                dimension_semantics=("parallel",),
            ),
        )(xT, weight, b_col)

    return yT.T  # back to PyTorch (B, OUT) layout


if __name__ == "__main__":
    key = jax.random.PRNGKey(0)
    k_w, k_b = jax.random.split(key)

    # Deterministic parameter init (shapes from nn.Linear(5, 5)).
    # PyTorch uses uniform(-1/sqrt(in), 1/sqrt(in)); mimic that range.
    bound = 1.0 / (IN_FEATURES ** 0.5)
    weight = jax.random.uniform(
        k_w, (OUT_FEATURES, IN_FEATURES), jnp.float32, -bound, bound
    )
    bias = jax.random.uniform(k_b, (OUT_FEATURES,), jnp.float32, -bound, bound)

    # Pure-VPU f32 reference (avoids any reduced-precision XLA matmul path).
    def ref_fn(xin):
        return jnp.sum(xin[:, :, None] * weight.T[None, :, :], axis=1) + bias

    # --- Spec input (batch=1): gridless lane-dense single-block path. ---
    x = jnp.array([[1.0, 2.0, 3.0, 4.0, 5.0]], dtype=jnp.float32)
    y = jax.block_until_ready(linear_forward(x, weight, bias))
    assert y.shape == (1, OUT_FEATURES)
    assert jnp.allclose(y, ref_fn(x), atol=1e-5, rtol=1e-5)

    # --- Ragged batch, forced onto the tiled "parallel" grid path with small
    #     tiles (B=1000, tile=256 -> 4 steps, last block masked). ---
    xb = jax.random.normal(jax.random.PRNGKey(1), (1000, IN_FEATURES), jnp.float32)
    yb = jax.block_until_ready(
        linear_forward(xb, weight, bias, batch_tile=256, single_block_max_batch=0)
    )
    assert yb.shape == (1000, OUT_FEATURES)
    assert jnp.allclose(yb, ref_fn(xb), atol=1e-4, rtol=1e-4)

    print("KERNEL_OK")
</pallas_src>

<mosaic_0001>
module attributes {stable_mosaic.version = 11 : i64} {
  func.func @linear_kernel(%arg0: memref<5x1xf32, #tpu.memory_space<vmem>>, %arg1: memref<5x5xf32, #tpu.memory_space<vmem>>, %arg2: memref<5x1xf32, #tpu.memory_space<vmem>>, %arg3: memref<5x1xf32, #tpu.memory_space<vmem>>) attributes {dimension_semantics = [], scalar_prefetch = 0 : i64, scratch_operands = 0 : i64, tpu.core_type = #tpu.core_type<tc>} {
    %c0 = arith.constant 0 : index
    %c0_0 = arith.constant 0 : index
    %0 = vector.load %arg0[%c0, %c0_0] : memref<5x1xf32, #tpu.memory_space<vmem>>, vector<5x1xf32>
    %c0_1 = arith.constant 0 : index
    %c0_2 = arith.constant 0 : index
    %1 = vector.load %arg1[%c0_1, %c0_2] : memref<5x5xf32, #tpu.memory_space<vmem>>, vector<5x5xf32>
    %c0_3 = arith.constant 0 : index
    %c0_4 = arith.constant 0 : index
    %2 = vector.load %arg2[%c0_3, %c0_4] : memref<5x1xf32, #tpu.memory_space<vmem>>, vector<5x1xf32>
    %3 = vector.extract_strided_slice %1 {offsets = [0, 0], sizes = [5, 1], strides = [1, 1]} : vector<5x5xf32> to vector<5x1xf32>
    %4 = vector.extract_strided_slice %0 {offsets = [0, 0], sizes = [1, 1], strides = [1, 1]} : vector<5x1xf32> to vector<1x1xf32>
    %5 = vector.broadcast %4 : vector<1x1xf32> to vector<5x1xf32>
    %6 = arith.mulf %3, %5 : vector<5x1xf32>
    %7 = arith.addf %2, %6 : vector<5x1xf32>
    %8 = vector.extract_strided_slice %1 {offsets = [0, 1], sizes = [5, 1], strides = [1, 1]} : vector<5x5xf32> to vector<5x1xf32>
    %9 = vector.extract_strided_slice %0 {offsets = [1, 0], sizes = [1, 1], strides = [1, 1]} : vector<5x1xf32> to vector<1x1xf32>
    %10 = vector.broadcast %9 : vector<1x1xf32> to vector<5x1xf32>
    %11 = arith.mulf %8, %10 : vector<5x1xf32>
    %12 = arith.addf %7, %11 : vector<5x1xf32>
    %13 = vector.extract_strided_slice %1 {offsets = [0, 2], sizes = [5, 1], strides = [1, 1]} : vector<5x5xf32> to vector<5x1xf32>
    %14 = vector.extract_strided_slice %0 {offsets = [2, 0], sizes = [1, 1], strides = [1, 1]} : vector<5x1xf32> to vector<1x1xf32>
    %15 = vector.broadcast %14 : vector<1x1xf32> to vector<5x1xf32>
    %16 = arith.mulf %13, %15 : vector<5x1xf32>
    %17 = arith.addf %12, %16 : vector<5x1xf32>
    %18 = vector.extract_strided_slice %1 {offsets = [0, 3], sizes = [5, 1], strides = [1, 1]} : vector<5x5xf32> to vector<5x1xf32>
    %19 = vector.extract_strided_slice %0 {offsets = [3, 0], sizes = [1, 1], strides = [1, 1]} : vector<5x1xf32> to vector<1x1xf32>
    %20 = vector.broadcast %19 : vector<1x1xf32> to vector<5x1xf32>
    %21 = arith.mulf %18, %20 : vector<5x1xf32>
    %22 = arith.addf %17, %21 : vector<5x1xf32>
    %23 = vector.extract_strided_slice %1 {offsets = [0, 4], sizes = [5, 1], strides = [1, 1]} : vector<5x5xf32> to vector<5x1xf32>
    %24 = vector.extract_strided_slice %0 {offsets = [4, 0], sizes = [1, 1], strides = [1, 1]} : vector<5x1xf32> to vector<1x1xf32>
    %25 = vector.broadcast %24 : vector<1x1xf32> to vector<5x1xf32>
    %26 = arith.mulf %23, %25 : vector<5x1xf32>
    %27 = arith.addf %22, %26 : vector<5x1xf32>
    %c0_5 = arith.constant 0 : index
    %c0_6 = arith.constant 0 : index
    %28 = vector.load %arg3[%c0_5, %c0_6] : memref<5x1xf32, #tpu.memory_space<vmem>>, vector<5x1xf32>
    tpu.vector_store %arg3[%c0_5, %c0_6], %27 {strides = array<i32>} : memref<5x1xf32, #tpu.memory_space<vmem>>, vector<5x1xf32>,
    return
  }
}

</mosaic_0001>

<bundles_post_ra>
// kernel: tpu_custom_call.1
= control target key start
LH: loop header
LB: loop body
LE: loop exit
PB: predicated region body
PF: predicated region fallthrough
CT: control target
= control target key end

     0   :  { %v17_v0 = vlaneseq  ;;  %s93_s14 = smov 1   ;;  %s94_s15 = smov 3   ;;  %vm79_vm0 = vcmask 4096   ;;  %s133_s0 = inlined_call_operand.vmem [shape: f32[5,1], index: 0, kind: input, shape index: {}]   ;;  %s134_s1 = inlined_call_operand.vmem [shape: f32[5,5], index: 1, kind: input, shape index: {}]   ;;  %s135_s2 = inlined_call_operand.vmem [shape: f32[5,1], index: 2, kind: input, shape index: {}]   ;;  %s136_s3 = inlined_call_operand.vmem [shape: f32[5,1], index: 3, kind: output, shape index: {}]  }
   0x1   :  { %v14_v2 = vld [vmem:[%s133_s0] sm:$0x1f]  ;;  %s95_s16 = smov 2   ;;  %s96_s17 = smov 4  }
   0x2   :  { %v18_v1 = vshrl.u32 %v17_v0, 7  ;;  %v15_v13 = vld [vmem:[%s134_s1] sm:$0x1f]  ;;  %s97_s19 = smov 127   ;;  %s98_s20 = smov 125  }
   0x3   :  { %s99_s21 = smov 126   ;;  %s100_s22 = smov 124   ;;  %v16_v23 = vld [vmem:[%s135_s2] sm:$0x1f] }
   0x4   :  { %v25_v3 = vsub.s32 1, %v18_v1  ;;  %v53_v4 = vsub.s32 3, %v18_v1  ;;  %v39_v5 = vsub.s32 2, %v18_v1  ;;  %v67_v6 = vsub.s32 4, %v18_v1 }
   0x5   :  { %v19_v11 = vsub.s32 0, %v18_v1 }
   0x6   :  { %v26_v7 = vrot.slane %v14_v2, %v25_v3  ;;  %v54_v8 = vrot.slane %v14_v2, %v53_v4  ;;  %v40_v9 = vrot.slane %v14_v2, %v39_v5  ;;  %v68_v10 = vrot.slane %v14_v2, %v67_v6 }
   0x7   :  { %v20_v12 = vrot.slane %v14_v2, %v19_v11 }
   0x8   :  { %28 = vrot.lane.b32.xlu0 %v26_v7, %s93_s14  ;;  %56 = vrot.lane.b32.xlu1 %v54_v8, %s94_s15 }
   0x9   :  { %v21_v14 = vmul.f32 %v20_v12, %v15_v13 }
   0xb   :  { %v22_v24 = vadd.f32 %v21_v14, %v16_v23 }
   0xc   :  { %42 = vrot.lane.b32.xlu0 %v40_v9, %s95_s16  ;;  %70 = vrot.lane.b32.xlu1 %v68_v10, %s96_s17 }
  0x7a   :  { %v29_v15 = vpop.permute.xlu0 %28  ;;  %v57_v16 = vpop.permute.xlu1 %56 }
  0x7b   :  { %v31_v17 = vmul.f32 %v29_v15, %v15_v13  ;;  %v59_v18 = vmul.f32 %v57_v16, %v15_v13 }
  0x7d   :  { %33 = vrot.lane.b32.xlu0 %v31_v17, %s97_s19 }
  0x7e   :  { %v43_v19 = vpop.permute.xlu0 %42  ;;  %v71_v20 = vpop.permute.xlu1 %70 }
  0x7f   :  { %v45_v21 = vmul.f32 %v43_v19, %v15_v13  ;;  %v73_v22 = vmul.f32 %v71_v20, %v15_v13 }
  0x81   :  { %61 = vrot.lane.b32.xlu0 %v59_v18, %s98_s20  ;;  %47 = vrot.lane.b32.xlu1 %v45_v21, %s99_s21 }
  0x85   :  { %75 = vrot.lane.b32.xlu1 %v73_v22, %s100_s22 }
  0xef   :  { %v34_v25 = vpop.permute.xlu0 %33 }
  0xf0   :  { %v36_v26 = vadd.f32 %v34_v25, %v22_v24 }
  0xf3   :  { %v48_v27 = vpop.permute.xlu1 %47  ;;  %v62_v29 = vpop.permute.xlu0 %61 }
  0xf4   :  { %v50_v28 = vadd.f32 %v48_v27, %v36_v26 }
  0xf6   :  { %v64_v30 = vadd.f32 %v62_v29, %v50_v28 }
  0xf7   :  { %v76_v31 = vpop.permute.xlu1 %75 }
  0xf8   :  { %v78_v32 = vadd.f32 %v76_v31, %v64_v30 }
  0xfa   :  { %80 = vst.msk [vmem:[%s136_s3] sm:$0x1f] %vm79_vm0, %v78_v32 }

</bundles_post_ra>
